<compile_context>
chip_gen: v7x
topology: tpu7x:2x2x1
jax: 0.10.0
libtpu: 0.0.40
codegen_flags: <defaults>
</compile_context>

<pallas_src>
import functools

import jax
import jax.numpy as jnp
from jax.experimental import pallas as pl
from jax.experimental.pallas import tpu as pltpu

LANE = 128
SUBLANE = 8
NEG_BIAS = -1e30  # bias for padded output columns -> exp() underflows to 0


def _round_up(n, m):
    return (n + m - 1) // m * m


def _mlp_logsoftmax_kernel(num_layers, x_ref, *refs):
    # refs = (w0, b0, w1, b1, ..., wf, bf, out_ref)
    out_ref = refs[-1]
    param_refs = refs[:-1]

    h = x_ref[...]  # bf16 (cast once in the wrapper)

    # Hidden layers: Linear + ReLU  (dropout = identity at inference).
    # bf16 MXU inputs, f32 accumulation; bias add / ReLU stay in f32 on the VPU.
    for i in range(num_layers):
        w = param_refs[2 * i][...]                       # (in_p, hid_p) bf16
        b = param_refs[2 * i + 1][...]                   # (1, hid_p)   f32
        h = jnp.dot(h.astype(jnp.bfloat16), w,
                    preferred_element_type=jnp.float32) + b
        h = jnp.maximum(h, 0.0)

    # Final Linear: hidden -> output (padded to 128 lanes).
    wf = param_refs[2 * num_layers][...]
    bf = param_refs[2 * num_layers + 1][...]
    logits = jnp.dot(h.astype(jnp.bfloat16), wf,
                     preferred_element_type=jnp.float32) + bf

    # LogSoftmax over the last dim. Padded columns carry a -1e30 bias, so the
    # max/sum reductions over the full 128-lane width are exact for the real
    # columns (exp(-1e30 - m) == 0).
    m = jnp.max(logits, axis=-1, keepdims=True)
    shifted = logits - m
    lse = jnp.log(jnp.sum(jnp.exp(shifted), axis=-1, keepdims=True))
    out_ref[...] = (shifted - lse).astype(out_ref.dtype)


def prepare_params(params, num_layers):
    """One-time parameter prep: pad feature dims to a multiple of 128 lanes and
    cast weights to bf16 (biases stay f32). Weights are in (in, out) layout,
    i.e. PyTorch nn.Linear weights transposed."""
    prepared = []
    n_linear = num_layers + 1
    for i in range(n_linear):
        w = params[2 * i]
        b = params[2 * i + 1].reshape(1, -1).astype(jnp.float32)
        fan_in, fan_out = w.shape
        # Layer 0 consumes the (unpadded) input features directly; later layers
        # consume the previous layer's lane-padded hidden activations.
        in_p = fan_in if i == 0 else _round_up(fan_in, LANE)
        out_p = _round_up(fan_out, LANE)

        w_p = jnp.zeros((in_p, out_p), jnp.bfloat16)
        w_p = w_p.at[:fan_in, :fan_out].set(w.astype(jnp.bfloat16))

        bias_fill = NEG_BIAS if i == n_linear - 1 else 0.0
        b_p = jnp.full((1, out_p), bias_fill, jnp.float32)
        b_p = b_p.at[:, :fan_out].set(b)

        prepared.extend([w_p, b_p])
    return prepared


def sentiment_classifier_forward(x, prepared_params, *, num_layers, output_size,
                                 block_batch=256):
    """x: (B, input_size) f32/bf16. prepared_params: output of prepare_params."""
    B, in_dim = x.shape
    out_p = prepared_params[-1].shape[-1]            # lane-padded output width

    # Batch tile: multiple of 8 sublanes, large enough to fill the MXU M dim.
    TB = block_batch if B >= block_batch else _round_up(B, SUBLANE)
    Bp = _round_up(B, TB)

    x_b = x.astype(jnp.bfloat16)                     # cast once, halves x DMA
    if Bp != B:
        x_b = jnp.pad(x_b, ((0, Bp - B), (0, 0)))

    kernel = functools.partial(_mlp_logsoftmax_kernel, num_layers)

    # Activations tile over the batch grid; every weight/bias uses a constant
    # index_map so it is fetched once and stays resident in VMEM.
    in_specs = [pl.BlockSpec((TB, in_dim), lambda i: (i, 0))]
    for p in prepared_params:
        in_specs.append(pl.BlockSpec(p.shape, lambda i: (0, 0)))

    out = pl.pallas_call(
        kernel,
        out_shape=jax.ShapeDtypeStruct((Bp, out_p), jnp.float32),
        grid=(Bp // TB,),
        in_specs=in_specs,
        out_specs=pl.BlockSpec((TB, out_p), lambda i: (i, 0)),
        compiler_params=pltpu.CompilerParams(
            dimension_semantics=("parallel",)),
    )(x_b, *prepared_params)

    # Drop batch padding and the lane padding of the output columns.
    return out[:B, :output_size]


def init_params(key, num_layers, input_size, hidden_size, output_size):
    """Deterministic init matching nn.Linear shapes (weights stored (in, out))."""
    params = []
    sizes = []
    for i in range(num_layers):
        fan_in = input_size if i == 0 else hidden_size
        sizes.append((fan_in, hidden_size))
    final_in = input_size if num_layers == 0 else hidden_size
    sizes.append((final_in, output_size))

    for (fan_in, fan_out) in sizes:
        key, kw, kb = jax.random.split(key, 3)
        bound = 1.0 / jnp.sqrt(fan_in)
        w = jax.random.uniform(kw, (fan_in, fan_out), jnp.float32, -bound, bound)
        b = jax.random.uniform(kb, (1, fan_out), jnp.float32, -bound, bound)
        params.extend([w, b])
    return params


def reference_forward(x, params, num_layers):
    """Pure-JAX reference mirroring the kernel's bf16-input / f32-accumulate math."""
    h = x.astype(jnp.bfloat16)
    for i in range(num_layers):
        w = params[2 * i].astype(jnp.bfloat16)
        b = params[2 * i + 1].reshape(1, -1)
        h = jnp.maximum(
            jnp.dot(h, w, preferred_element_type=jnp.float32) + b, 0.0)
        h = h.astype(jnp.bfloat16)
    wf = params[2 * num_layers].astype(jnp.bfloat16)
    bf = params[2 * num_layers + 1].reshape(1, -1)
    logits = jnp.dot(h, wf, preferred_element_type=jnp.float32) + bf
    return jax.nn.log_softmax(logits, axis=-1)


if __name__ == "__main__":
    num_layers = 2
    input_size = 32
    hidden_size = 64
    output_size = 8
    batch = 300          # exercises both batch padding and multiple batch tiles

    key = jax.random.PRNGKey(0)
    key, kx = jax.random.split(key)
    x = jax.random.normal(kx, (batch, input_size), jnp.float32)

    params = init_params(key, num_layers, input_size, hidden_size, output_size)
    prepared = prepare_params(params, num_layers)   # one-time pad + bf16 cast

    out = sentiment_classifier_forward(
        x, prepared, num_layers=num_layers, output_size=output_size,
        block_batch=256)
    out = jax.block_until_ready(out)

    ref = reference_forward(x, params, num_layers)
    assert out.shape == (batch, output_size)
    assert jnp.allclose(out, ref, atol=1e-3, rtol=1e-3)

    print("KERNEL_OK")
</pallas_src>

<mosaic_0001>
module attributes {stable_mosaic.version = 11 : i64} {
  func.func @_mlp_logsoftmax_kernel(%arg0: i32, %arg1: memref<256x32xbf16, #tpu.memory_space<vmem>>, %arg2: memref<32x128xbf16, #tpu.memory_space<vmem>>, %arg3: memref<1x128xf32, #tpu.memory_space<vmem>>, %arg4: memref<128x128xbf16, #tpu.memory_space<vmem>>, %arg5: memref<1x128xf32, #tpu.memory_space<vmem>>, %arg6: memref<128x128xbf16, #tpu.memory_space<vmem>>, %arg7: memref<1x128xf32, #tpu.memory_space<vmem>>, %arg8: memref<256x128xf32, #tpu.memory_space<vmem>>) attributes {dimension_semantics = [#tpu.dimension_semantics<parallel>], iteration_bounds = array<i64: 2>, scalar_prefetch = 0 : i64, scratch_operands = 0 : i64, tpu.core_type = #tpu.core_type<tc>, window_params = [{transform_indices = @transform_0, window_bounds = array<i64: 256, 32>}, {pipeline_mode = #tpu.pipeline_mode<synchronous>, transform_indices = @transform_1, window_bounds = array<i64: 32, 128>}, {pipeline_mode = #tpu.pipeline_mode<synchronous>, transform_indices = @transform_2, window_bounds = array<i64: 1, 128>}, {pipeline_mode = #tpu.pipeline_mode<synchronous>, transform_indices = @transform_3, window_bounds = array<i64: 128, 128>}, {pipeline_mode = #tpu.pipeline_mode<synchronous>, transform_indices = @transform_4, window_bounds = array<i64: 1, 128>}, {pipeline_mode = #tpu.pipeline_mode<synchronous>, transform_indices = @transform_5, window_bounds = array<i64: 128, 128>}, {pipeline_mode = #tpu.pipeline_mode<synchronous>, transform_indices = @transform_6, window_bounds = array<i64: 1, 128>}, {transform_indices = @transform_7, window_bounds = array<i64: 256, 128>}]} {
    %c0 = arith.constant 0 : index
    %c0_0 = arith.constant 0 : index
    %0 = vector.load %arg1[%c0, %c0_0] : memref<256x32xbf16, #tpu.memory_space<vmem>>, vector<256x32xbf16>
    %c0_1 = arith.constant 0 : index
    %c0_2 = arith.constant 0 : index
    %1 = vector.load %arg2[%c0_1, %c0_2] : memref<32x128xbf16, #tpu.memory_space<vmem>>, vector<32x128xbf16>
    %c0_3 = arith.constant 0 : index
    %c0_4 = arith.constant 0 : index
    %2 = vector.load %arg3[%c0_3, %c0_4] : memref<1x128xf32, #tpu.memory_space<vmem>>, vector<1x128xf32>
    %cst = arith.constant dense<0.000000e+00> : vector<256x128xf32>
    %3 = tpu.matmul %0, %1, %cst {dimension_numbers = #tpu.dot_dimension_numbers<[1], [0], [0], [1], [0, 0, 1, 1], [], []>} : vector<256x32xbf16>, vector<32x128xbf16>, vector<256x128xf32> -> vector<256x128xf32>
    %4 = vector.broadcast %2 : vector<1x128xf32> to vector<256x128xf32>
    %5 = arith.addf %3, %4 : vector<256x128xf32>
    %cst_5 = arith.constant 0.000000e+00 : f32
    %6 = vector.broadcast %cst_5 : f32 to vector<256x128xf32>
    %7 = arith.maximumf %5, %6 : vector<256x128xf32>
    %c0_6 = arith.constant 0 : index
    %c0_7 = arith.constant 0 : index
    %8 = vector.load %arg4[%c0_6, %c0_7] : memref<128x128xbf16, #tpu.memory_space<vmem>>, vector<128x128xbf16>
    %c0_8 = arith.constant 0 : index
    %c0_9 = arith.constant 0 : index
    %9 = vector.load %arg5[%c0_8, %c0_9] : memref<1x128xf32, #tpu.memory_space<vmem>>, vector<1x128xf32>
    %10 = arith.truncf %7 : vector<256x128xf32> to vector<256x128xbf16>
    %cst_10 = arith.constant dense<0.000000e+00> : vector<256x128xf32>
    %11 = tpu.matmul %10, %8, %cst_10 {dimension_numbers = #tpu.dot_dimension_numbers<[1], [0], [0], [1], [0, 0, 1, 1], [], []>} : vector<256x128xbf16>, vector<128x128xbf16>, vector<256x128xf32> -> vector<256x128xf32>
    %12 = vector.broadcast %9 : vector<1x128xf32> to vector<256x128xf32>
    %13 = arith.addf %11, %12 : vector<256x128xf32>
    %cst_11 = arith.constant 0.000000e+00 : f32
    %14 = vector.broadcast %cst_11 : f32 to vector<256x128xf32>
    %15 = arith.maximumf %13, %14 : vector<256x128xf32>
    %c0_12 = arith.constant 0 : index
    %c0_13 = arith.constant 0 : index
    %16 = vector.load %arg6[%c0_12, %c0_13] : memref<128x128xbf16, #tpu.memory_space<vmem>>, vector<128x128xbf16>
    %c0_14 = arith.constant 0 : index
    %c0_15 = arith.constant 0 : index
    %17 = vector.load %arg7[%c0_14, %c0_15] : memref<1x128xf32, #tpu.memory_space<vmem>>, vector<1x128xf32>
    %18 = arith.truncf %15 : vector<256x128xf32> to vector<256x128xbf16>
    %cst_16 = arith.constant dense<0.000000e+00> : vector<256x128xf32>
    %19 = tpu.matmul %18, %16, %cst_16 {dimension_numbers = #tpu.dot_dimension_numbers<[1], [0], [0], [1], [0, 0, 1, 1], [], []>} : vector<256x128xbf16>, vector<128x128xbf16>, vector<256x128xf32> -> vector<256x128xf32>
    %20 = vector.broadcast %17 : vector<1x128xf32> to vector<256x128xf32>
    %21 = arith.addf %19, %20 : vector<256x128xf32>
    %cst_17 = arith.constant dense<0xFF800000> : vector<256xf32>
    %22 = vector.multi_reduction <maximumf>, %21, %cst_17 [1] : vector<256x128xf32> to vector<256xf32>
    %23 = vector.shape_cast %22 : vector<256xf32> to vector<256x1xf32>
    %24 = vector.broadcast %23 : vector<256x1xf32> to vector<256x128xf32>
    %25 = arith.subf %21, %24 : vector<256x128xf32>
    %26 = math.exp %25 : vector<256x128xf32>
    %cst_18 = arith.constant dense<0.000000e+00> : vector<256xf32>
    %27 = vector.multi_reduction <add>, %26, %cst_18 [1] : vector<256x128xf32> to vector<256xf32>
    %28 = vector.shape_cast %27 : vector<256xf32> to vector<256x1xf32>
    %29 = math.log %28 : vector<256x1xf32>
    %30 = vector.broadcast %29 : vector<256x1xf32> to vector<256x128xf32>
    %31 = arith.subf %25, %30 : vector<256x128xf32>
    %c0_19 = arith.constant 0 : index
    %c0_20 = arith.constant 0 : index
    %32 = vector.load %arg8[%c0_19, %c0_20] : memref<256x128xf32, #tpu.memory_space<vmem>>, vector<256x128xf32>
    tpu.vector_store %arg8[%c0_19, %c0_20], %31 {strides = array<i32>} : memref<256x128xf32, #tpu.memory_space<vmem>>, vector<256x128xf32>,
    return
  }
  func.func @transform_0(%arg0: i32) -> (i32, i32) {
    %c0_i32 = arith.constant 0 : i32
    %c0_i32_0 = arith.constant 0 : i32
    return %arg0, %c0_i32 : i32, i32
  }
  func.func @transform_1(%arg0: i32) -> (i32, i32) {
    %c0_i32 = arith.constant 0 : i32
    %c0_i32_0 = arith.constant 0 : i32
    %c0_i32_1 = arith.constant 0 : i32
    return %c0_i32, %c0_i32_0 : i32, i32
  }
  func.func @transform_2(%arg0: i32) -> (i32, i32) {
    %c0_i32 = arith.constant 0 : i32
    %c0_i32_0 = arith.constant 0 : i32
    %c0_i32_1 = arith.constant 0 : i32
    return %c0_i32, %c0_i32_0 : i32, i32
  }
  func.func @transform_3(%arg0: i32) -> (i32, i32) {
    %c0_i32 = arith.constant 0 : i32
    %c0_i32_0 = arith.constant 0 : i32
    %c0_i32_1 = arith.constant 0 : i32
    return %c0_i32, %c0_i32_0 : i32, i32
  }
  func.func @transform_4(%arg0: i32) -> (i32, i32) {
    %c0_i32 = arith.constant 0 : i32
    %c0_i32_0 = arith.constant 0 : i32
    %c0_i32_1 = arith.constant 0 : i32
    return %c0_i32, %c0_i32_0 : i32, i32
  }
  func.func @transform_5(%arg0: i32) -> (i32, i32) {
    %c0_i32 = arith.constant 0 : i32
    %c0_i32_0 = arith.constant 0 : i32
    %c0_i32_1 = arith.constant 0 : i32
    return %c0_i32, %c0_i32_0 : i32, i32
  }
  func.func @transform_6(%arg0: i32) -> (i32, i32) {
    %c0_i32 = arith.constant 0 : i32
    %c0_i32_0 = arith.constant 0 : i32
    %c0_i32_1 = arith.constant 0 : i32
    return %c0_i32, %c0_i32_0 : i32, i32
  }
  func.func @transform_7(%arg0: i32) -> (i32, i32) {
    %c0_i32 = arith.constant 0 : i32
    %c0_i32_0 = arith.constant 0 : i32
    return %arg0, %c0_i32 : i32, i32
  }
}

</mosaic_0001>

<bundles_post_ra>
// kernel: tpu_custom_call.1
= control target key start
LH: loop header
LB: loop body
LE: loop exit
PB: predicated region body
PF: predicated region fallthrough
CT: control target
= control target key end

     0   :  { %12 = vsyncpa [#allocation3], 0  ;;  %s2794_s0 = inlined_call_operand.vmem [shape: bf16[512,32], index: 0, kind: input, shape index: {}]   ;;  %s2795_s1 = inlined_call_operand.vmem [shape: bf16[32,128], index: 1, kind: input, shape index: {}]   ;;  %s2796_s2 = inlined_call_operand.vmem [shape: f32[1,128], index: 2, kind: input, shape index: {}]   ;;  %s2797_s3 = inlined_call_operand.vmem [shape: bf16[128,128], index: 3, kind: input, shape index: {}]   ;;  %s2798_s4 = inlined_call_operand.vmem [shape: f32[1,128], index: 4, kind: input, shape index: {}]   ;;  %s2799_s5 = inlined_call_operand.vmem [shape: bf16[128,128], index: 5, kind: input, shape index: {}]   ;;  %s2800_s6 = inlined_call_operand.vmem [shape: f32[1,128], index: 6, kind: input, shape index: {}]   ;;  %s2801_s7 = inlined_call_operand.hbm [shape: f32[512,128], index: 7, kind: output, shape index: {}]  }
   0x1   :  { %14 = vsyncpa [#allocation3 + $0x1], 0  ;;  %s2192_s24 = smov 0   ;;  %s2194_s25 = smov 0  }
   0x2   :  { %s2196_s26 = smov 0   ;;  %s2198_s27 = smov 0  }
   0x3 LB: > { %s2213_s28 = sadd.s32 4294967295, %s2147_s27   ;;  %s1614_s29 = sadd.s32 4294967294, %s2147_s27   ;;  %s2147_s27 = sphi %s2198_s27, %s2807_s27   ;;  %s2143_s26 = sphi %s2196_s26, %s2806_s26   ;;  %s2139_s25 = sphi %s2194_s25, %s2805_s25   ;;  %s2135_s24 = sphi %s2192_s24, %s2804_s24  }
   0x4   : > { %s2217_s30 = sadd.s32 1, %s2147_s27   ;;  %s179_s8 = sadd.s32 1, %s2143_s26 }
   0x5   : > { %s176_s9 = ssub.s32 %s2147_s27, %s2217_s30  ;;  %p189_p0 = scmp.ne.s32.totalorder %s2143_s26, %s2139_s25 }
   0x6   : > { %p177_p1 = scmp.eq.s32.totalorder %s176_s9, 0  ;;  %p190_p2 = scmp.eq.s32.totalorder %s2213_s28, 1 }
   0x7   : > { %p195_p3 = scmp.ne.s32.totalorder %s2139_s25, %s2135_s24  ;;  %p196_p4 = scmp.eq.s32.totalorder %s1614_s29, 1 }
   0x8   : > { %s2228_s10 = scalar_select %p177_p1, %s2143_s26, %s179_s8  }
   0x9   : > { %p2230_p5 = por %p190_p2, %p189_p0  ;;  %p2234_p6 = por %p196_p4, %p195_p3 }
   0xa   : > { %p1617_p7 = scmp.ge.s32.totalorder %s2147_s27, 1  ;;  %p241_p8 = scmp.lt.s32.totalorder %s2147_s27, 3 }
   0xc   : > { %p242_p9 = pnand %p1617_p7, %p241_p8 }
   0xd   : > { %v1923_v0 = vld [vmem:[%s2795_s1] sm:$0xff] (!%p242_p9)   ;;  %s1619_s15 = sshll.u32 (!%p242_p9), %s2213_s28, 5  ;;  %v1924_v1 = vld [vmem:[%s2795_s1 + $0x8] sm:$0xff] (!%p242_p9)   ;;  %vm416_vm0 = vcmask (!%p242_p9), 261120   ;;  %v1943_v12 = vld [vmem:[%s2797_s3 + $0x10] sm:$0xff] (!%p242_p9)   ;;  %s270_s18 = sand.u32 (!%p242_p9), 1, %s2139_s25  }
   0xe   : > { %245 = sbr.rel (%p242_p9) target bundleno = 1077 (0x435), region = 48  ;;  %p274_p10 = scmp.lt.s32.totalorder (!%p242_p9), %s1619_s15, 63  ;;  %1746 = vmatprep.subr.bf16.mxu0 (!%p242_p9), %v1923_v0  ;;  %1878 = vmatprep.subr.bf16.mxu1 (!%p242_p9), %v1923_v0  ;;  %v1941_v2 = vld [vmem:[%s2797_s3] sm:$0xff] (!%p242_p9)   ;;  %v1942_v9 = vld [vmem:[%s2797_s3 + $0x8] sm:$0xff] (!%p242_p9)   ;;  %v1944_v17 = vld [vmem:[%s2797_s3 + $0x18] sm:$0xff] (!%p242_p9)  }
   0xf   : > { %1747 = vmatpush3.bf16.msra.mxu0 (!%p242_p9), %v1923_v0  ;;  %1880 = vmatpush3.bf16.msra.mxu1 (!%p242_p9), %v1923_v0  ;;  %v1945_v18 = vld [vmem:[%s2797_s3 + $0x20] sm:$0xff] (!%p242_p9)   ;;  %v1946_v22 = vld [vmem:[%s2797_s3 + $0x28] sm:$0xff] (!%p242_p9)   ;;  %v1947_v24 = vld [vmem:[%s2797_s3 + $0x30] sm:$0xff] (!%p242_p9)   ;;  %s1618_s19 = sshll.u32 (!%p242_p9), %s270_s18, 8  ;;  %s1679_s21 = sshll.u32 (!%p242_p9), %s2213_s28, 12 }
  0x10   : > { %1748 = vmatprep.subr.bf16.mxu0 (!%p242_p9), %v1924_v1  ;;  %1879 = vmatprep.subr.bf16.mxu1 (!%p242_p9), %v1924_v1  ;;  %v1948_v25 = vld [vmem:[%s2797_s3 + $0x38] sm:$0xff] (!%p242_p9)   ;;  %v1949_v26 = vld [vmem:[%s2799_s5] sm:$0xff] (!%p242_p9)   ;;  %v1950_v27 = vld [vmem:[%s2799_s5 + $0x8] sm:$0xff] (!%p242_p9)   ;;  %s2745_s9 = scalar_lea.hbm (!%p242_p9), %s2801_s7, %s1679_s21  ;;  %s2753_s28 = scalar_lea.sflag (!%p242_p9), [#allocation3], %s270_s18 }
  0x11   : > { %v1951_v28 = vld [vmem:[%s2799_s5 + $0x10] sm:$0xff] (!%p242_p9)   ;;  %v1952_v29 = vld [vmem:[%s2799_s5 + $0x18] sm:$0xff] (!%p242_p9)   ;;  %v1953_v30 = vld [vmem:[%s2799_s5 + $0x20] sm:$0xff] (!%p242_p9)   ;;  %s2149_s13 = smov (!%p242_p9), [#allocation2]  }
  0x12   : > { %v1954_v31 = vld [vmem:[%s2799_s5 + $0x28] sm:$0xff] (!%p242_p9)   ;;  %v2329_v32 = vld [vmem:[%s2796_s2] ss:$0 sm:$0xff] (!%p242_p9)  ;;  %s2089_s14 = sshll.u32 (!%p242_p9), %s2149_s13, 4  ;;  %s2090_s14 = int_to_ptr.vmem [resolvable:$false] %s2089_s14 }
  0x13   : > { %1749 = vmatpush3.bf16.msra.mxu0 (!%p242_p9), %v1924_v1  ;;  %1881 = vmatpush3.bf16.msra.mxu1 (!%p242_p9), %v1924_v1 }
  0x14   : > { %1782 = vmatprep.subr.bf16.mxu1 (!%p242_p9), %v1941_v2  ;;  %1830 = vmatprep.subr.bf16.mxu0 (!%p242_p9), %v1949_v26 }
  0x15   : > { %s2809_s15 = smov (!%p274_p10, %s1619_s15), 63 }
  0x16   : > { %s1620_s20 = sshll.u32 %s2809_s15, 2  ;;  %s2091_s15 = scalar_lea.vmem %s2090_s14, 8192 }
  0x17   : > { %s2253_s23 = scalar_lea.vmem %s2794_s0, %s1620_s20  ;;  %s2677_s20 = scalar_lea.vmem [#allocation2], %s1618_s19 }
  0x18   : > { %v1925_v3 = vld [vmem:[%s2253_s23] sm:$0xff]   ;;  %v1926_v4 = vld [vmem:[%s2253_s23 + $0x8] sm:$0xff]   ;;  %v1927_v5 = vld [vmem:[%s2253_s23 + $0x10] sm:$0xff]   ;;  %s1552_s22 = sshll.u32 %s2677_s20, 4  ;;  %s2747_s22 = int_to_ptr.vmem [resolvable:$true] %s1552_s22 }
  0x19   : > { %1750 = vmatprep.mubr.msk.bf16.mxu0 %vm416_vm0, %v1925_v3  ;;  %v1928_v6 = vld [vmem:[%s2253_s23 + $0x18] sm:$0xff]   ;;  %v1929_v7 = vld [vmem:[%s2253_s23 + $0x20] sm:$0xff]   ;;  %v1934_v10 = vld [vmem:[%s2253_s23 + $0x48] sm:$0xff]   ;;  %p2092_p0 = scmp.lt.s32.totalorder %s2747_s22, %s2090_s14 }
  0x1a   : > { %1751 = vmatmul.mubr.msk.bf16.vlgmr.msra.gmra.mrb[0].mxu0 %vm416_vm0, %v1926_v4  ;;  %v1933_v8 = vld [vmem:[%s2253_s23 + $0x40] sm:$0xff]   ;;  %v1935_v11 = vld [vmem:[%s2253_s23 + $0x50] sm:$0xff]   ;;  %v1930_v13 = vld [vmem:[%s2253_s23 + $0x28] sm:$0xff]  }
  0x1b   : > { %1754 = vmatprep.mubr.msk.bf16.mxu0 %vm416_vm0, %v1927_v5  ;;  %1766 = vmatprep.mubr.msk.bf16.mxu1 %vm416_vm0, %v1933_v8  ;;  %v1931_v14 = vld [vmem:[%s2253_s23 + $0x30] sm:$0xff]   ;;  %v1936_v15 = vld [vmem:[%s2253_s23 + $0x58] sm:$0xff]   ;;  %v1937_v16 = vld [vmem:[%s2253_s23 + $0x60] sm:$0xff]  }
  0x1c   : > { %1767 = vmatmul.mubr.msk.bf16.vlgmr.msra.gmra.mrb[0].mxu1 %vm416_vm0, %v1934_v10  ;;  %v1932_v19 = vld [vmem:[%s2253_s23 + $0x38] sm:$0xff]   ;;  %v1938_v20 = vld [vmem:[%s2253_s23 + $0x68] sm:$0xff]   ;;  %v1939_v21 = vld [vmem:[%s2253_s23 + $0x70] sm:$0xff]   ;;  %1831 = vmatpush3.bf16.msra.mxu0 %v1949_v26 }
  0x1d   : > { %1770 = vmatprep.mubr.msk.bf16.mxu1 %vm416_vm0, %v1935_v11  ;;  %1783 = vmatpush3.bf16.msra.mxu1 %v1941_v2  ;;  %v1940_v23 = vld [vmem:[%s2253_s23 + $0x78] sm:$0xff]   ;;  %s2085_s23 = scalar_lea.vmem %s2747_s22, 4096 }
  0x1e   : > { %1784 = vmatprep.subr.bf16.mxu1 %v1942_v9  ;;  %1832 = vmatprep.subr.bf16.mxu0 %v1950_v27  ;;  %p2086_p11 = scmp.ne.s32.totalorder %s2747_s22, %s2085_s23  ;;  %p2093_p1 = scmp.lt.s32.totalorder %s2091_s15, %s2085_s23 }
  0x20   : > { %1833 = vmatpush3.bf16.msra.mxu0 %v1950_v27  ;;  %p2087_p12 = pnand %p2086_p11, %p2230_p5  ;;  %p2094_p2 = por %p2093_p1, %p2092_p0 }
  0x21   : > { %1785 = vmatpush3.bf16.msra.mxu1 %v1942_v9  ;;  %1834 = vmatprep.subr.bf16.mxu0 %v1951_v28 }
  0x22   : > { %1755 = vmatmul.mubr.msk.bf16.gmra.mrb[4].mxu0 %vm416_vm0, %v1928_v6  ;;  %1786 = vmatprep.subr.bf16.mxu1 %v1943_v12  ;;  %p2088_p13 = pneg %p2087_p12 }
  0x23   : > { %1758 = vmatprep.mubr.msk.bf16.mxu0 %vm416_vm0, %v1929_v7 }
  0x24   : > { %1771 = vmatmul.mubr.msk.bf16.gmra.mrb[4].mxu1 %vm416_vm0, %v1936_v15  ;;  %1835 = vmatpush3.bf16.msra.mxu0 %v1951_v28  ;;  %p2095_p3 = pnand %p2094_p2, %p2088_p13 }
  0x25   : > { %1774 = vmatprep.mubr.msk.bf16.mxu1 %vm416_vm0, %v1937_v16  ;;  %1787 = vmatpush3.bf16.msra.mxu1 %v1943_v12 }
  0x26   : > { %1788 = vmatprep.subr.bf16.mxu1 %v1944_v17  ;;  %1836 = vmatprep.subr.bf16.mxu0 %v1952_v29 }
  0x28   : > { %1837 = vmatpush3.bf16.msra.mxu0 %v1952_v29 }
  0x29   : > { %1789 = vmatpush3.bf16.msra.mxu1 %v1944_v17  ;;  %1838 = vmatprep.subr.bf16.mxu0 %v1953_v30 }
  0x2a   : > { %1759 = vmatmul.mubr.msk.bf16.gmra.mrb[8].mxu0 %vm416_vm0, %v1930_v13  ;;  %1790 = vmatprep.subr.bf16.mxu1 %v1945_v18 }
  0x2b   : > { %1762 = vmatprep.mubr.msk.bf16.mxu0 %vm416_vm0, %v1931_v14 }
  0x2c   : > { %1775 = vmatmul.mubr.msk.bf16.gmra.mrb[8].mxu1 %vm416_vm0, %v1938_v20  ;;  %1839 = vmatpush3.bf16.msra.mxu0 %v1953_v30 }
  0x2d   : > { %1778 = vmatprep.mubr.msk.bf16.mxu1 %vm416_vm0, %v1939_v21  ;;  %1791 = vmatpush3.bf16.msra.mxu1 %v1945_v18 }
  0x2e   : > { %1792 = vmatprep.subr.bf16.mxu1 %v1946_v22  ;;  %1840 = vmatprep.subr.bf16.mxu0 %v1954_v31 }
  0x30   : > { %1841 = vmatpush3.bf16.msra.mxu0 %v1954_v31 }
  0x31   : > { %1793 = vmatpush3.bf16.msra.mxu1 %v1946_v22 }
  0x32   : > { %1763 = vmatmul.mubr.msk.bf16.gmra.mrb[12].mxu0 %vm416_vm0, %v1932_v19  ;;  %1794 = vmatprep.subr.bf16.mxu1 %v1947_v24 }
  0x34   : > { %1779 = vmatmul.mubr.msk.bf16.gmra.mrb[12].mxu1 %vm416_vm0, %v1940_v23 }
  0x35   : > { %1795 = vmatpush3.bf16.msra.mxu1 %v1947_v24 }
  0x36   : > { %1796 = vmatprep.subr.bf16.mxu1 %v1948_v25 }
  0x39   : > { %1797 = vmatpush3.bf16.msra.mxu1 %v1948_v25 }
  0xed   : > { %v1752_v33 = vpop.f32.mrb[0].mxu0 }
  0xee   : > { %v508_v34 = vadd.f32 %v1752_v33, %v2329_v32  ;;  %v499_v35 = vpop.f32.mrb[1].mxu0 }
  0xef   : > { %v500_v36 = vadd.f32 %v2329_v32, %v499_v35  ;;  %v1753_v37 = vpop.f32.mrb[2].mxu0  ;;  %v1768_v48 = vpop.f32.mrb[0].mxu1 }
  0xf0   : > { %v511_v38 = vadd.f32 %v1753_v37, %v2329_v32  ;;  %v502_v39 = vpop.f32.mrb[3].mxu0  ;;  %v628_v41 = vmax.f32 %v508_v34, 0.0  ;;  %v572_v51 = vadd.f32 %v1768_v48, %v2329_v32  ;;  %v563_v52 = vpop.f32.mrb[1].mxu1 }
  0xf1   : > { %v503_v40 = vadd.f32 %v2329_v32, %v502_v39  ;;  %v626_v43 = vmax.f32 %v500_v36, 0.0  ;;  %v564_v55 = vadd.f32 %v2329_v32, %v563_v52  ;;  %v1769_v56 = vpop.f32.mrb[2].mxu1 }
  0xf2   : > { %v629_v42 = vmax.f32 %v511_v38, 0.0  ;;  %v644_v60 = vmax.f32 %v572_v51, 0.0  ;;  %v575_v61 = vadd.f32 %v1769_v56, %v2329_v32  ;;  %v566_v62 = vpop.f32.mrb[3].mxu1 }
  0xf3   : > { %v627_v44 = vmax.f32 %v503_v40, 0.0  ;;  %v642_v0 = vmax.f32 %v564_v55, 0.0  ;;  %v567_v1 = vadd.f32 %v2329_v32, %v566_v62 }
  0xf4   : > { %v676_v45 = vpack.c.bf16 %v629_v42, %v628_v41  ;;  %v645_v3 = vmax.f32 %v575_v61, 0.0 }
  0xf5   : > { %v675_v46 = vpack.c.bf16 %v627_v44, %v626_v43  ;;  %v1756_v47 = vpop.f32.mrb[4].mxu0  ;;  %v643_v6 = vmax.f32 %v567_v1, 0.0 }
  0xf6   : > { %v524_v49 = vadd.f32 %v1756_v47, %v2329_v32  ;;  %v515_v50 = vpop.f32.mrb[5].mxu0  ;;  %v2343_v8 = vpack.c.bf16 %v645_v3, %v644_v60 }
  0xf7   : > { %v516_v53 = vadd.f32 %v2329_v32, %v515_v50  ;;  %v1757_v54 = vpop.f32.mrb[6].mxu0  ;;  %1798 = vmatprep.mubr.bf16.mxu1 %v675_v46  ;;  %v2345_v11 = vpack.c.bf16 %v643_v6, %v642_v0  ;;  %v1772_v12 = vpop.f32.mrb[4].mxu1 }
  0xf8   : > { %v632_v57 = vmax.f32 %v524_v49, 0.0  ;;  %v527_v58 = vadd.f32 %v1757_v54, %v2329_v32  ;;  %v518_v59 = vpop.f32.mrb[7].mxu0  ;;  %1799 = vmatmul.mubr.bf16.vlgmr.msra.gmra.mrb[16].mxu1 %v676_v45  ;;  %v588_v15 = vadd.f32 %v1772_v12, %v2329_v32  ;;  %v579_v16 = vpop.f32.mrb[5].mxu1 }
  0xf9   : > { %v519_v63 = vadd.f32 %v2329_v32, %v518_v59  ;;  %v630_v4 = vmax.f32 %v516_v53, 0.0  ;;  %v580_v19 = vadd.f32 %v2329_v32, %v579_v16  ;;  %v1773_v20 = vpop.f32.mrb[6].mxu1 }
  0xfa   : > { %v633_v2 = vmax.f32 %v527_v58, 0.0  ;;  %v648_v24 = vmax.f32 %v588_v15, 0.0  ;;  %v591_v25 = vadd.f32 %v1773_v20, %v2329_v32  ;;  %v582_v26 = vpop.f32.mrb[7].mxu1  ;;  %v1955_v20 = vld [vmem:[%s2799_s5 + $0x30] sm:$0xff]  }
  0xfb   : > { %v631_v5 = vmax.f32 %v519_v63, 0.0  ;;  %v646_v28 = vmax.f32 %v580_v19, 0.0  ;;  %v583_v29 = vadd.f32 %v2329_v32, %v582_v26  ;;  %1842 = vmatprep.subr.bf16.mxu0 %v1955_v20 }
  0xfc   : > { %v678_v7 = vpack.c.bf16 %v633_v2, %v632_v57  ;;  %v649_v31 = vmax.f32 %v591_v25, 0.0  ;;  %1843 = vmatpush3.bf16.msra.mxu0 %v1955_v20 }
  0xfd   : > { %v677_v9 = vpack.c.bf16 %v631_v5, %v630_v4  ;;  %v1760_v10 = vpop.f32.mrb[8].mxu0  ;;  %v647_v35 = vmax.f32 %v583_v29, 0.0 }
  0xfe   : > { %v540_v13 = vadd.f32 %v1760_v10, %v2329_v32  ;;  %v531_v14 = vpop.f32.mrb[9].mxu0  ;;  %v686_v37 = vpack.c.bf16 %v649_v31, %v648_v24 }
  0xff   : > { %v532_v17 = vadd.f32 %v2329_v32, %v531_v14  ;;  %v1761_v18 = vpop.f32.mrb[10].mxu0  ;;  %1802 = vmatprep.mubr.bf16.mxu1 %v677_v9  ;;  %v685_v40 = vpack.c.bf16 %v647_v35, %v646_v28  ;;  %v1776_v41 = vpop.f32.mrb[8].mxu1 }
 0x100   : > { %v636_v21 = vmax.f32 %v540_v13, 0.0  ;;  %v543_v22 = vadd.f32 %v1761_v18, %v2329_v32  ;;  %v534_v23 = vpop.f32.mrb[11].mxu0  ;;  %1803 = vmatmul.mubr.bf16.gmra.mrb[20].mxu1 %v678_v7  ;;  %v604_v44 = vadd.f32 %v1776_v41, %v2329_v32  ;;  %v595_v45 = vpop.f32.mrb[9].mxu1 }
 0x101   : > { %v535_v27 = vadd.f32 %v2329_v32, %v534_v23  ;;  %v634_v33 = vmax.f32 %v532_v17, 0.0  ;;  %v596_v48 = vadd.f32 %v2329_v32, %v595_v45  ;;  %v1777_v49 = vpop.f32.mrb[10].mxu1 }
 0x102   : > { %v637_v30 = vmax.f32 %v543_v22, 0.0  ;;  %v652_v53 = vmax.f32 %v604_v44, 0.0  ;;  %v607_v54 = vadd.f32 %v1777_v49, %v2329_v32  ;;  %v598_v55 = vpop.f32.mrb[11].mxu1 }
 0x103   : > { %v635_v34 = vmax.f32 %v535_v27, 0.0  ;;  %v650_v57 = vmax.f32 %v596_v48, 0.0  ;;  %v599_v58 = vadd.f32 %v2329_v32, %v598_v55 }
 0x104   : > { %v680_v36 = vpack.c.bf16 %v637_v30, %v636_v21  ;;  %v653_v60 = vmax.f32 %v607_v54, 0.0 }
 0x105   : > { %v679_v38 = vpack.c.bf16 %v635_v34, %v634_v33  ;;  %v1764_v39 = vpop.f32.mrb[12].mxu0  ;;  %v651_v63 = vmax.f32 %v599_v58, 0.0 }
 0x106   : > { %v556_v42 = vadd.f32 %v1764_v39, %v2329_v32  ;;  %v547_v43 = vpop.f32.mrb[13].mxu0  ;;  %v688_v1 = vpack.c.bf16 %v653_v60, %v652_v53 }
 0x107   : > { %v548_v46 = vadd.f32 %v2329_v32, %v547_v43  ;;  %v1765_v47 = vpop.f32.mrb[14].mxu0  ;;  %1806 = vmatprep.mubr.bf16.mxu1 %v679_v38  ;;  %v687_v3 = vpack.c.bf16 %v651_v63, %v650_v57  ;;  %v1780_v4 = vpop.f32.mrb[12].mxu1 }
 0x108   : > { %v640_v50 = vmax.f32 %v556_v42, 0.0  ;;  %v559_v51 = vadd.f32 %v1765_v47, %v2329_v32  ;;  %v550_v52 = vpop.f32.mrb[15].mxu0  ;;  %1807 = vmatmul.mubr.bf16.gmra.mrb[24].mxu1 %v680_v36  ;;  %v620_v5 = vadd.f32 %v1780_v4, %v2329_v32  ;;  %v611_v6 = vpop.f32.mrb[13].mxu1 }
 0x109   : > { %v551_v56 = vadd.f32 %v2329_v32, %v550_v52  ;;  %v638_v61 = vmax.f32 %v548_v46, 0.0  ;;  %v612_v7 = vadd.f32 %v2329_v32, %v611_v6  ;;  %v1781_v9 = vpop.f32.mrb[14].mxu1 }
 0x10a   : > { %v641_v59 = vmax.f32 %v559_v51, 0.0  ;;  %v656_v10 = vmax.f32 %v620_v5, 0.0  ;;  %v623_v12 = vadd.f32 %v1781_v9, %v2329_v32  ;;  %v614_v13 = vpop.f32.mrb[15].mxu1 }
 0x10b   : > { %v639_v62 = vmax.f32 %v551_v56, 0.0  ;;  %v654_v14 = vmax.f32 %v612_v7, 0.0  ;;  %v615_v15 = vadd.f32 %v2329_v32, %v614_v13  ;;  %v1956_v32 = vld [vmem:[%s2799_s5 + $0x38] sm:$0xff]  }
 0x10c   : > { %v682_v0 = vpack.c.bf16 %v641_v59, %v640_v50  ;;  %v657_v16 = vmax.f32 %v623_v12, 0.0  ;;  %1844 = vmatprep.subr.bf16.mxu0 %v1956_v32 }
 0x10d   : > { %v681_v2 = vpack.c.bf16 %v639_v62, %v638_v61  ;;  %v655_v17 = vmax.f32 %v615_v15, 0.0  ;;  %1845 = vmatpush3.bf16.msra.mxu0 %v1956_v32 }
 0x10e   : > { %v690_v18 = vpack.c.bf16 %v657_v16, %v656_v10 }
 0x10f   : > { %1810 = vmatprep.mubr.bf16.mxu1 %v681_v2  ;;  %v689_v19 = vpack.c.bf16 %v655_v17, %v654_v14 }
 0x110   : > { %1811 = vmatmul.mubr.bf16.gmra.mrb[28].mxu1 %v682_v0 }
 0x111   : > { %1814 = vmatprep.mubr.bf16.mxu1 %v2345_v11 }
 0x118   : > { %1815 = vmatmul.mubr.bf16.gmra.mrb[32].mxu1 %v2343_v8  ;;  %v2378_v8 = vld [vmem:[%s2798_s4] ss:$0 sm:$0xff] }
 0x119   : > { %1818 = vmatprep.mubr.bf16.mxu1 %v685_v40 }
 0x120   : > { %1819 = vmatmul.mubr.bf16.gmra.mrb[36].mxu1 %v686_v37 }
 0x121   : > { %1822 = vmatprep.mubr.bf16.mxu1 %v687_v3 }
 0x128   : > { %1823 = vmatmul.mubr.bf16.gmra.mrb[40].mxu1 %v688_v1 }
 0x129   : > { %1826 = vmatprep.mubr.bf16.mxu1 %v689_v19 }
 0x130   : > { %1827 = vmatmul.mubr.bf16.gmra.mrb[44].mxu1 %v690_v18 }
 0x1cb   : > { %v1800_v11 = vpop.f32.mrb[16].mxu1 }
 0x1cc   : > { %v788_v21 = vadd.f32 %v1800_v11, %v2378_v8  ;;  %v779_v22 = vpop.f32.mrb[17].mxu1 }
 0x1cd   : > { %v780_v23 = vadd.f32 %v2378_v8, %v779_v22  ;;  %v1801_v24 = vpop.f32.mrb[18].mxu1 }
 0x1ce   : > { %v791_v25 = vadd.f32 %v1801_v24, %v2378_v8  ;;  %v782_v26 = vpop.f32.mrb[19].mxu1  ;;  %v908_v28 = vmax.f32 %v788_v21, 0.0 }
 0x1cf   : > { %v783_v27 = vadd.f32 %v2378_v8, %v782_v26  ;;  %v906_v30 = vmax.f32 %v780_v23, 0.0 }
 0x1d0   : > { %v909_v29 = vmax.f32 %v791_v25, 0.0 }
 0x1d1   : > { %v907_v31 = vmax.f32 %v783_v27, 0.0 }
 0x1d2   : > { %v956_v33 = vpack.c.bf16 %v909_v29, %v908_v28 }
 0x1d3   : > { %v955_v34 = vpack.c.bf16 %v907_v31, %v906_v30  ;;  %v1804_v35 = vpop.f32.mrb[20].mxu1 }
 0x1d4   : > { %v804_v36 = vadd.f32 %v1804_v35, %v2378_v8  ;;  %v795_v37 = vpop.f32.mrb[21].mxu1 }
 0x1d5   : > { %v796_v38 = vadd.f32 %v2378_v8, %v795_v37  ;;  %v1805_v39 = vpop.f32.mrb[22].mxu1  ;;  %1846 = vmatprep.mubr.bf16.mxu0 %v955_v34 }
 0x1d6   : > { %v807_v40 = vadd.f32 %v1805_v39, %v2378_v8  ;;  %v798_v41 = vpop.f32.mrb[23].mxu1  ;;  %1847 = vmatmul.mubr.bf16.vlgmr.msra.gmra.mrb[16].mxu0 %v956_v33  ;;  %v912_v43 = vmax.f32 %v804_v36, 0.0 }
 0x1d7   : > { %v799_v42 = vadd.f32 %v2378_v8, %v798_v41  ;;  %v910_v45 = vmax.f32 %v796_v38, 0.0 }
 0x1d8   : > { %v913_v44 = vmax.f32 %v807_v40, 0.0 }
 0x1d9   : > { %v911_v46 = vmax.f32 %v799_v42, 0.0 }
 0x1da   : > { %v958_v47 = vpack.c.bf16 %v913_v44, %v912_v43 }
 0x1db   : > { %v957_v48 = vpack.c.bf16 %v911_v46, %v910_v45  ;;  %v1808_v49 = vpop.f32.mrb[24].mxu1 }
 0x1dc   : > { %v820_v50 = vadd.f32 %v1808_v49, %v2378_v8  ;;  %v811_v51 = vpop.f32.mrb[25].mxu1 }
 0x1dd   : > { %v812_v52 = vadd.f32 %v2378_v8, %v811_v51  ;;  %v1809_v53 = vpop.f32.mrb[26].mxu1  ;;  %1850 = vmatprep.mubr.bf16.mxu0 %v957_v48 }
 0x1de   : > { %v823_v54 = vadd.f32 %v1809_v53, %v2378_v8  ;;  %v814_v55 = vpop.f32.mrb[27].mxu1  ;;  %1851 = vmatmul.mubr.bf16.gmra.mrb[20].mxu0 %v958_v47  ;;  %v916_v57 = vmax.f32 %v820_v50, 0.0 }
 0x1df   : > { %v815_v56 = vadd.f32 %v2378_v8, %v814_v55  ;;  %v914_v59 = vmax.f32 %v812_v52, 0.0 }
 0x1e0   : > { %v917_v58 = vmax.f32 %v823_v54, 0.0 }
 0x1e1   : > { %v915_v60 = vmax.f32 %v815_v56, 0.0 }
 0x1e2   : > { %v960_v61 = vpack.c.bf16 %v917_v58, %v916_v57 }
 0x1e3   : > { %v959_v62 = vpack.c.bf16 %v915_v60, %v914_v59  ;;  %v1812_v63 = vpop.f32.mrb[28].mxu1 }
 0x1e4   : > { %v836_v0 = vadd.f32 %v1812_v63, %v2378_v8  ;;  %v827_v1 = vpop.f32.mrb[29].mxu1 }
 0x1e5   : > { %v828_v2 = vadd.f32 %v2378_v8, %v827_v1  ;;  %v1813_v3 = vpop.f32.mrb[30].mxu1  ;;  %1854 = vmatprep.mubr.bf16.mxu0 %v959_v62 }
 0x1e6   : > { %v839_v4 = vadd.f32 %v1813_v3, %v2378_v8  ;;  %v830_v5 = vpop.f32.mrb[31].mxu1  ;;  %1855 = vmatmul.mubr.bf16.gmra.mrb[24].mxu0 %v960_v61  ;;  %v920_v7 = vmax.f32 %v836_v0, 0.0 }
 0x1e7   : > { %v831_v6 = vadd.f32 %v2378_v8, %v830_v5  ;;  %v918_v10 = vmax.f32 %v828_v2, 0.0 }
 0x1e8   : > { %v921_v9 = vmax.f32 %v839_v4, 0.0 }
 0x1e9   : > { %v919_v12 = vmax.f32 %v831_v6, 0.0  ;;  %v2415_v6 = vld [vmem:[%s2800_s6] ss:$0 sm:$0xff] }
 0x1ea   : > { %v962_v13 = vpack.c.bf16 %v921_v9, %v920_v7 }
 0x1eb   : > { %v961_v14 = vpack.c.bf16 %v919_v12, %v918_v10  ;;  %v1816_v15 = vpop.f32.mrb[32].mxu1 }
 0x1ec   : > { %v852_v16 = vadd.f32 %v1816_v15, %v2378_v8  ;;  %v843_v17 = vpop.f32.mrb[33].mxu1 }
 0x1ed   : > { %v844_v18 = vadd.f32 %v2378_v8, %v843_v17  ;;  %v1817_v19 = vpop.f32.mrb[34].mxu1  ;;  %1858 = vmatprep.mubr.bf16.mxu0 %v961_v14 }
 0x1ee   : > { %v855_v20 = vadd.f32 %v1817_v19, %v2378_v8  ;;  %v846_v32 = vpop.f32.mrb[35].mxu1  ;;  %1859 = vmatmul.mubr.bf16.gmra.mrb[28].mxu0 %v962_v13  ;;  %v924_v21 = vmax.f32 %v852_v16, 0.0 }
 0x1ef   : > { %v847_v11 = vadd.f32 %v2378_v8, %v846_v32  ;;  %v922_v23 = vmax.f32 %v844_v18, 0.0 }
 0x1f0   : > { %v925_v22 = vmax.f32 %v855_v20, 0.0 }
 0x1f1   : > { %v923_v24 = vmax.f32 %v847_v11, 0.0 }
 0x1f2   : > { %v964_v25 = vpack.c.bf16 %v925_v22, %v924_v21 }
 0x1f3   : > { %v963_v26 = vpack.c.bf16 %v923_v24, %v922_v23  ;;  %v1820_v27 = vpop.f32.mrb[36].mxu1 }
 0x1f4   : > { %v868_v28 = vadd.f32 %v1820_v27, %v2378_v8  ;;  %v859_v29 = vpop.f32.mrb[37].mxu1 }
 0x1f5   : > { %v860_v30 = vadd.f32 %v2378_v8, %v859_v29  ;;  %v1821_v31 = vpop.f32.mrb[38].mxu1  ;;  %1862 = vmatprep.mubr.bf16.mxu0 %v963_v26 }
 0x1f6   : > { %v871_v33 = vadd.f32 %v1821_v31, %v2378_v8  ;;  %v862_v34 = vpop.f32.mrb[39].mxu1  ;;  %1863 = vmatmul.mubr.bf16.gmra.mrb[32].mxu0 %v964_v25  ;;  %v928_v36 = vmax.f32 %v868_v28, 0.0 }
 0x1f7   : > { %v863_v35 = vadd.f32 %v2378_v8, %v862_v34  ;;  %v926_v38 = vmax.f32 %v860_v30, 0.0 }
 0x1f8   : > { %v929_v37 = vmax.f32 %v871_v33, 0.0 }
 0x1f9   : > { %v927_v39 = vmax.f32 %v863_v35, 0.0 }
 0x1fa   : > { %v966_v40 = vpack.c.bf16 %v929_v37, %v928_v36 }
 0x1fb   : > { %v965_v41 = vpack.c.bf16 %v927_v39, %v926_v38  ;;  %v1824_v42 = vpop.f32.mrb[40].mxu1 }
 0x1fc   : > { %v884_v43 = vadd.f32 %v1824_v42, %v2378_v8  ;;  %v875_v44 = vpop.f32.mrb[41].mxu1 }
 0x1fd   : > { %v876_v45 = vadd.f32 %v2378_v8, %v875_v44  ;;  %v1825_v46 = vpop.f32.mrb[42].mxu1  ;;  %1866 = vmatprep.mubr.bf16.mxu0 %v965_v41 }
 0x1fe   : > { %v887_v47 = vadd.f32 %v1825_v46, %v2378_v8  ;;  %v878_v48 = vpop.f32.mrb[43].mxu1  ;;  %1867 = vmatmul.mubr.bf16.gmra.mrb[36].mxu0 %v966_v40  ;;  %v932_v50 = vmax.f32 %v884_v43, 0.0 }
 0x1ff   : > { %v879_v49 = vadd.f32 %v2378_v8, %v878_v48  ;;  %v930_v52 = vmax.f32 %v876_v45, 0.0 }
 0x200   : > { %v933_v51 = vmax.f32 %v887_v47, 0.0 }
 0x201   : > { %v931_v53 = vmax.f32 %v879_v49, 0.0 }
 0x202   : > { %v968_v54 = vpack.c.bf16 %v933_v51, %v932_v50 }
 0x203   : > { %v967_v55 = vpack.c.bf16 %v931_v53, %v930_v52  ;;  %v1828_v56 = vpop.f32.mrb[44].mxu1 }
 0x204   : > { %v900_v57 = vadd.f32 %v1828_v56, %v2378_v8  ;;  %v891_v58 = vpop.f32.mrb[45].mxu1 }
 0x205   : > { %v892_v59 = vadd.f32 %v2378_v8, %v891_v58  ;;  %v1829_v60 = vpop.f32.mrb[46].mxu1  ;;  %1870 = vmatprep.mubr.bf16.mxu0 %v967_v55 }
 0x206   : > { %v903_v61 = vadd.f32 %v1829_v60, %v2378_v8  ;;  %v894_v62 = vpop.f32.mrb[47].mxu1  ;;  %1871 = vmatmul.mubr.bf16.gmra.mrb[40].mxu0 %v968_v54  ;;  %v936_v0 = vmax.f32 %v900_v57, 0.0 }
 0x207   : > { %v895_v63 = vadd.f32 %v2378_v8, %v894_v62  ;;  %v934_v2 = vmax.f32 %v892_v59, 0.0 }
 0x208   : > { %v937_v1 = vmax.f32 %v903_v61, 0.0 }
 0x209   : > { %v935_v3 = vmax.f32 %v895_v63, 0.0 }
 0x20a   : > { %v970_v4 = vpack.c.bf16 %v937_v1, %v936_v0 }
 0x20b   : > { %v969_v5 = vpack.c.bf16 %v935_v3, %v934_v2 }
 0x20d   : > { %1874 = vmatprep.mubr.bf16.mxu0 %v969_v5 }
 0x20e   : > { %1875 = vmatmul.mubr.bf16.gmra.mrb[44].mxu0 %v970_v4 }
 0x2a9   : > { %v1848_v7 = vpop.f32.mrb[16].mxu0 }
 0x2aa   : > { %v2418_v9 = vadd.f32 %v1848_v7, %v2415_v6  ;;  %v1059_v10 = vpop.f32.mrb[17].mxu0 }
 0x2ab   : > { %v2421_v8 = vadd.f32 %v2415_v6, %v1059_v10  ;;  %v1849_v12 = vpop.f32.mrb[18].mxu0 }
 0x2ac   : > { %1190 = vmax.xlane.f32.xlu1 %v2418_v9  ;;  %v1062_v13 = vpop.f32.mrb[19].mxu0  ;;  %v2426_v14 = vadd.f32 %v1849_v12, %v2415_v6 }
 0x2ad   : > { %1186 = vmax.xlane.f32.xlu0 %v2421_v8  ;;  %v2429_v15 = vadd.f32 %v2415_v6, %v1062_v13 }
 0x2b0   : > { %1192 = vmax.xlane.f32.xlu1 %v2426_v14 }
 0x2b1   : > { %v1852_v16 = vpop.f32.mrb[20].mxu0  ;;  %1188 = vmax.xlane.f32.xlu0 %v2429_v15 }
 0x2b2   : > { %v2434_v17 = vadd.f32 %v1852_v16, %v2415_v6  ;;  %v1075_v18 = vpop.f32.mrb[21].mxu0 }
 0x2b3   : > { %v1853_v19 = vpop.f32.mrb[22].mxu0  ;;  %v2442_v11 = vadd.f32 %v2415_v6, %v1075_v18 }
 0x2b4   : > { %v2437_v20 = vadd.f32 %v1853_v19, %v2415_v6  ;;  %v1078_v32 = vpop.f32.mrb[23].mxu0 }
 0x2b5   : > { %1198 = vmax.xlane.f32.xlu0 %v2434_v17  ;;  %v2445_v21 = vadd.f32 %v2415_v6, %v1078_v32 }
 0x2b6   : > { %1200 = vmax.xlane.f32.xlu1 %v2437_v20 }
 0x2b9   : > { %v1856_v22 = vpop.f32.mrb[24].mxu0  ;;  %1194 = vmax.xlane.f32.xlu0 %v2442_v11 }
 0x2ba   : > { %v2449_v23 = vadd.f32 %v1856_v22, %v2415_v6  ;;  %v1091_v24 = vpop.f32.mrb[25].mxu0  ;;  %1196 = vmax.xlane.f32.xlu1 %v2445_v21 }
 0x2bb   : > { %v1857_v25 = vpop.f32.mrb[26].mxu0  ;;  %v2458_v28 = vadd.f32 %v2415_v6, %v1091_v24 }
 0x2bc   : > { %v2453_v26 = vadd.f32 %v1857_v25, %v2415_v6  ;;  %v1094_v27 = vpop.f32.mrb[27].mxu0 }
 0x2bd   : > { %1206 = vmax.xlane.f32.xlu0 %v2449_v23  ;;  %v2461_v29 = vadd.f32 %v2415_v6, %v1094_v27 }
 0x2be   : > { %1208 = vmax.xlane.f32.xlu1 %v2453_v26 }
 0x2c1   : > { %v1860_v30 = vpop.f32.mrb[28].mxu0  ;;  %1202 = vmax.xlane.f32.xlu0 %v2458_v28 }
 0x2c2   : > { %v2465_v31 = vadd.f32 %v1860_v30, %v2415_v6  ;;  %v1107_v33 = vpop.f32.mrb[29].mxu0  ;;  %1204 = vmax.xlane.f32.xlu1 %v2461_v29 }
 0x2c3   : > { %v1861_v34 = vpop.f32.mrb[30].mxu0  ;;  %v2474_v37 = vadd.f32 %v2415_v6, %v1107_v33 }
 0x2c4   : > { %v2469_v35 = vadd.f32 %v1861_v34, %v2415_v6  ;;  %v1110_v36 = vpop.f32.mrb[31].mxu0 }
 0x2c5   : > { %1214 = vmax.xlane.f32.xlu0 %v2465_v31  ;;  %v2477_v38 = vadd.f32 %v2415_v6, %v1110_v36 }
 0x2c6   : > { %1216 = vmax.xlane.f32.xlu1 %v2469_v35 }
 0x2c9   : > { %v1864_v39 = vpop.f32.mrb[32].mxu0  ;;  %1210 = vmax.xlane.f32.xlu0 %v2474_v37 }
 0x2ca   : > { %v2481_v40 = vadd.f32 %v1864_v39, %v2415_v6  ;;  %v1123_v41 = vpop.f32.mrb[33].mxu0  ;;  %1212 = vmax.xlane.f32.xlu1 %v2477_v38 }
 0x2cb   : > { %v1865_v42 = vpop.f32.mrb[34].mxu0  ;;  %v2490_v45 = vadd.f32 %v2415_v6, %v1123_v41 }
 0x2cc   : > { %v2485_v43 = vadd.f32 %v1865_v42, %v2415_v6  ;;  %v1126_v44 = vpop.f32.mrb[35].mxu0 }
 0x2cd   : > { %1222 = vmax.xlane.f32.xlu0 %v2481_v40  ;;  %v2493_v46 = vadd.f32 %v2415_v6, %v1126_v44 }
 0x2ce   : > { %1224 = vmax.xlane.f32.xlu1 %v2485_v43 }
 0x2d1   : > { %v1868_v47 = vpop.f32.mrb[36].mxu0  ;;  %1218 = vmax.xlane.f32.xlu0 %v2490_v45 }
 0x2d2   : > { %v2497_v48 = vadd.f32 %v1868_v47, %v2415_v6  ;;  %v1139_v49 = vpop.f32.mrb[37].mxu0  ;;  %1220 = vmax.xlane.f32.xlu1 %v2493_v46 }
 0x2d3   : > { %v1869_v50 = vpop.f32.mrb[38].mxu0  ;;  %v2506_v53 = vadd.f32 %v2415_v6, %v1139_v49 }
 0x2d4   : > { %v2501_v51 = vadd.f32 %v1869_v50, %v2415_v6  ;;  %v1142_v52 = vpop.f32.mrb[39].mxu0 }
 0x2d5   : > { %1230 = vmax.xlane.f32.xlu0 %v2497_v48  ;;  %v2509_v54 = vadd.f32 %v2415_v6, %v1142_v52 }
 0x2d6   : > { %1232 = vmax.xlane.f32.xlu1 %v2501_v51 }
 0x2d9   : > { %v1872_v55 = vpop.f32.mrb[40].mxu0  ;;  %1226 = vmax.xlane.f32.xlu0 %v2506_v53 }
 0x2da   : > { %v2513_v56 = vadd.f32 %v1872_v55, %v2415_v6  ;;  %v1155_v57 = vpop.f32.mrb[41].mxu0  ;;  %1228 = vmax.xlane.f32.xlu1 %v2509_v54 }
 0x2db   : > { %v1873_v58 = vpop.f32.mrb[42].mxu0  ;;  %v2522_v61 = vadd.f32 %v2415_v6, %v1155_v57 }
 0x2dc   : > { %v2517_v59 = vadd.f32 %v1873_v58, %v2415_v6  ;;  %v1158_v60 = vpop.f32.mrb[43].mxu0 }
 0x2dd   : > { %1238 = vmax.xlane.f32.xlu0 %v2513_v56  ;;  %v2525_v62 = vadd.f32 %v2415_v6, %v1158_v60 }
 0x2de   : > { %1240 = vmax.xlane.f32.xlu1 %v2517_v59 }
 0x2e1   : > { %v1876_v63 = vpop.f32.mrb[44].mxu0  ;;  %1234 = vmax.xlane.f32.xlu0 %v2522_v61 }
 0x2e2   : > { %v1171_v0 = vpop.f32.mrb[45].mxu0  ;;  %1236 = vmax.xlane.f32.xlu1 %v2525_v62  ;;  %v2537_v5 = vadd.f32 %v1876_v63, %v2415_v6 }
 0x2e3   : > { %v2530_v1 = vadd.f32 %v2415_v6, %v1171_v0  ;;  %v1877_v2 = vpop.f32.mrb[46].mxu0 }
 0x2e4   : > { %v1174_v3 = vpop.f32.mrb[47].mxu0  ;;  %v2541_v7 = vadd.f32 %v1877_v2, %v2415_v6 }
 0x2e5   : > { %v2533_v4 = vadd.f32 %v2415_v6, %v1174_v3  ;;  %1242 = vmax.xlane.f32.xlu0 %v2530_v1 }
 0x2e7   : > { %1244 = vmax.xlane.f32.xlu1 %v2533_v4 }
 0x2e9   : > { %1246 = vmax.xlane.f32.xlu0 %v2537_v5 }
 0x2eb   : > { %1248 = vmax.xlane.f32.xlu1 %v2541_v7 }
 0x339   : > { %v1191_v10 = vpop.xlane.xlu1 %1190 }
 0x33a   : > { %v2546_v12 = vsub.f32 %v2418_v9, %v1191_v10  ;;  %v1187_v13 = vpop.xlane.xlu0 %1186 }
 0x33b   : > { %v2549_v16 = vsub.f32 %v2421_v8, %v1187_v13 }
 0x33c   : > { %v1286_v18 = vmul.f32 1.442695, %v2546_v12 }
 0x33d   : > { %v1282_v19 = vmul.f32 1.442695, %v2549_v16  ;;  %v1193_v32 = vpop.xlane.xlu1 %1192 }
 0x33e   : > { %1957 = vpow2.f32 %v1286_v18  ;;  %v2554_v6 = vsub.f32 %v2426_v14, %v1193_v32  ;;  %v1189_v22 = vpop.xlane.xlu0 %1188 }
 0x33f   : > { %v2557_v24 = vsub.f32 %v2429_v15, %v1189_v22  ;;  %1959 = vpow2.f32 %v1282_v19 }
 0x340   : > { %v1288_v9 = vmul.f32 1.442695, %v2554_v6 }
 0x341   : > { %v1284_v8 = vmul.f32 1.442695, %v2557_v24 }
 0x342   : > { %1961 = vpow2.f32 %v1288_v9  ;;  %v1199_v25 = vpop.xlane.xlu0 %1198 }
 0x343   : > { %v2562_v27 = vsub.f32 %v2434_v17, %v1199_v25  ;;  %v1201_v30 = vpop.xlane.xlu1 %1200  ;;  %1963 = vpow2.f32 %v1284_v8 }
 0x344   : > { %v2565_v33 = vsub.f32 %v2437_v20, %v1201_v30 }
 0x345   : > { %v1294_v14 = vmul.f32 1.442695, %v2562_v27 }
 0x346   : > { %v1296_v15 = vmul.f32 1.442695, %v2565_v33  ;;  %v1195_v34 = vpop.xlane.xlu0 %1194 }
 0x347   : > { %1965 = vpow2.f32 %v1294_v14  ;;  %v2570_v36 = vsub.f32 %v2442_v11, %v1195_v34  ;;  %v1197_v39 = vpop.xlane.xlu1 %1196 }
 0x348   : > { %v1958_v41 = vpop.eup %1957  ;;  %v2573_v42 = vsub.f32 %v2445_v21, %v1197_v39  ;;  %1967 = vpow2.f32 %v1296_v15 }
 0x349   : > { %v1290_v17 = vmul.f32 1.442695, %v2570_v36  ;;  %1350 = vadd.xlane.f32.xlu0 %v1958_v41  ;;  %v1960_v47 = vpop.eup %1959 }
 0x34a   : > { %v1292_v20 = vmul.f32 1.442695, %v2573_v42  ;;  %v1207_v44 = vpop.xlane.xlu0 %1206 }
 0x34b   : > { %1969 = vpow2.f32 %v1290_v17  ;;  %v2578_v49 = vsub.f32 %v2449_v23, %v1207_v44  ;;  %v1209_v50 = vpop.xlane.xlu1 %1208 }
 0x34c   : > { %v1962_v11 = vpop.eup %1961  ;;  %v2581_v52 = vsub.f32 %v2453_v26, %v1209_v50  ;;  %1971 = vpow2.f32 %v1292_v20 }
 0x34d   : > { %v1302_v21 = vmul.f32 1.442695, %v2578_v49  ;;  %1352 = vadd.xlane.f32.xlu1 %v1962_v11  ;;  %1346 = vadd.xlane.f32.xlu0 %v1960_v47  ;;  %v1964_v23 = vpop.eup %1963 }
 0x34e   : > { %v1304_v55 = vmul.f32 1.442695, %v2581_v52  ;;  %v1203_v57 = vpop.xlane.xlu0 %1202 }
 0x34f   : > { %1973 = vpow2.f32 %v1302_v21  ;;  %v2586_v58 = vsub.f32 %v2458_v28, %v1203_v57  ;;  %v1205_v60 = vpop.xlane.xlu1 %1204 }
 0x350   : > { %v2589_v63 = vsub.f32 %v2461_v29, %v1205_v60  ;;  %1975 = vpow2.f32 %v1304_v55 }
 0x351   : > { %v1966_v0 = vpop.eup %1965  ;;  %v1298_v26 = vmul.f32 1.442695, %v2586_v58  ;;  %1348 = vadd.xlane.f32.xlu1 %v1964_v23 }
 0x352   : > { %v1300_v2 = vmul.f32 1.442695, %v2589_v63  ;;  %1358 = vadd.xlane.f32.xlu0 %v1966_v0  ;;  %v1215_v3 = vpop.xlane.xlu0 %1214  ;;  %v1968_v13 = vpop.eup %1967 }
 0x353   : > { %1977 = vpow2.f32 %v1298_v26  ;;  %v2594_v10 = vsub.f32 %v2465_v31, %v1215_v3  ;;  %v1217_v28 = vpop.xlane.xlu1 %1216 }
 0x354   : > { %v2597_v18 = vsub.f32 %v2469_v35, %v1217_v28  ;;  %1979 = vpow2.f32 %v1300_v2 }
 0x355   : > { %v1970_v29 = vpop.eup %1969  ;;  %v1310_v19 = vmul.f32 1.442695, %v2594_v10  ;;  %1360 = vadd.xlane.f32.xlu1 %v1968_v13 }
 0x356   : > { %v1312_v32 = vmul.f32 1.442695, %v2597_v18  ;;  %1354 = vadd.xlane.f32.xlu0 %v1970_v29  ;;  %v1211_v22 = vpop.xlane.xlu0 %1210  ;;  %v1972_v8 = vpop.eup %1971 }
 0x357   : > { %1981 = vpow2.f32 %v1310_v19  ;;  %v2602_v9 = vsub.f32 %v2474_v37, %v1211_v22  ;;  %v1213_v31 = vpop.xlane.xlu1 %1212 }
 0x358   : > { %v2605_v25 = vsub.f32 %v2477_v38, %v1213_v31  ;;  %1983 = vpow2.f32 %v1312_v32 }
 0x359   : > { %v1974_v35 = vpop.eup %1973  ;;  %v1306_v30 = vmul.f32 1.442695, %v2602_v9  ;;  %1356 = vadd.xlane.f32.xlu1 %v1972_v8 }
 0x35a   : > { %v1308_v14 = vmul.f32 1.442695, %v2605_v25  ;;  %1366 = vadd.xlane.f32.xlu0 %v1974_v35  ;;  %v1223_v15 = vpop.xlane.xlu0 %1222  ;;  %v1976_v39 = vpop.eup %1975 }
 0x35b   : > { %1985 = vpow2.f32 %v1306_v30  ;;  %v2610_v34 = vsub.f32 %v2481_v40, %v1223_v15  ;;  %v1225_v37 = vpop.xlane.xlu1 %1224 }
 0x35c   : > { %v2613_v41 = vsub.f32 %v2485_v43, %v1225_v37  ;;  %1987 = vpow2.f32 %v1308_v14 }
 0x35d   : > { %v1978_v38 = vpop.eup %1977  ;;  %v1318_v17 = vmul.f32 1.442695, %v2610_v34  ;;  %1368 = vadd.xlane.f32.xlu1 %v1976_v39 }
 0x35e   : > { %v1320_v20 = vmul.f32 1.442695, %v2613_v41  ;;  %1362 = vadd.xlane.f32.xlu0 %v1978_v38  ;;  %v1219_v44 = vpop.xlane.xlu0 %1218  ;;  %v1980_v50 = vpop.eup %1979 }
 0x35f   : > { %1989 = vpow2.f32 %v1318_v17  ;;  %v2618_v47 = vsub.f32 %v2490_v45, %v1219_v44  ;;  %v1221_v40 = vpop.xlane.xlu1 %1220 }
 0x360   : > { %v2621_v11 = vsub.f32 %v2493_v46, %v1221_v40  ;;  %1991 = vpow2.f32 %v1320_v20 }
 0x361   : > { %v1982_v43 = vpop.eup %1981  ;;  %v1314_v21 = vmul.f32 1.442695, %v2618_v47  ;;  %1364 = vadd.xlane.f32.xlu1 %v1980_v50 }
 0x362   : > { %v1316_v55 = vmul.f32 1.442695, %v2621_v11  ;;  %1374 = vadd.xlane.f32.xlu0 %v1982_v43  ;;  %v1231_v57 = vpop.xlane.xlu0 %1230  ;;  %v1984_v23 = vpop.eup %1983 }
 0x363   : > { %1993 = vpow2.f32 %v1314_v21  ;;  %v2626_v60 = vsub.f32 %v2497_v48, %v1231_v57  ;;  %v1233_v45 = vpop.xlane.xlu1 %1232 }
 0x364   : > { %v2629_v0 = vsub.f32 %v2501_v51, %v1233_v45  ;;  %1995 = vpow2.f32 %v1316_v55 }
 0x365   : > { %v1986_v46 = vpop.eup %1985  ;;  %v1326_v26 = vmul.f32 1.442695, %v2626_v60  ;;  %1376 = vadd.xlane.f32.xlu1 %v1984_v23 }
 0x366   : > { %v1328_v2 = vmul.f32 1.442695, %v2629_v0  ;;  %1370 = vadd.xlane.f32.xlu0 %v1986_v46  ;;  %v1227_v3 = vpop.xlane.xlu0 %1226  ;;  %v1988_v13 = vpop.eup %1987 }
 0x367   : > { %1997 = vpow2.f32 %v1326_v26  ;;  %v2634_v28 = vsub.f32 %v2506_v53, %v1227_v3  ;;  %v1229_v48 = vpop.xlane.xlu1 %1228 }
 0x368   : > { %v2637_v29 = vsub.f32 %v2509_v54, %v1229_v48  ;;  %1999 = vpow2.f32 %v1328_v2 }
 0x369   : > { %v1990_v51 = vpop.eup %1989  ;;  %v1322_v19 = vmul.f32 1.442695, %v2634_v28  ;;  %1372 = vadd.xlane.f32.xlu1 %v1988_v13 }
 0x36a   : > { %v1324_v32 = vmul.f32 1.442695, %v2637_v29  ;;  %1382 = vadd.xlane.f32.xlu0 %v1990_v51  ;;  %v1239_v22 = vpop.xlane.xlu0 %1238  ;;  %v1992_v8 = vpop.eup %1991 }
 0x36b   : > { %2001 = vpow2.f32 %v1322_v19  ;;  %v2642_v31 = vsub.f32 %v2513_v56, %v1239_v22  ;;  %v1241_v53 = vpop.xlane.xlu1 %1240 }
 0x36c   : > { %v2645_v35 = vsub.f32 %v2517_v59, %v1241_v53  ;;  %2003 = vpow2.f32 %v1324_v32 }
 0x36d   : > { %v1994_v54 = vpop.eup %1993  ;;  %v1334_v30 = vmul.f32 1.442695, %v2642_v31  ;;  %1384 = vadd.xlane.f32.xlu1 %v1992_v8 }
 0x36e   : > { %v1336_v14 = vmul.f32 1.442695, %v2645_v35  ;;  %1378 = vadd.xlane.f32.xlu0 %v1994_v54  ;;  %v1235_v15 = vpop.xlane.xlu0 %1234  ;;  %v1996_v39 = vpop.eup %1995 }
 0x36f   : > { %2005 = vpow2.f32 %v1334_v30  ;;  %v2650_v37 = vsub.f32 %v2522_v61, %v1235_v15  ;;  %v1237_v56 = vpop.xlane.xlu1 %1236 }
 0x370   : > { %v2653_v38 = vsub.f32 %v2525_v62, %v1237_v56  ;;  %2007 = vpow2.f32 %v1336_v14 }
 0x371   : > { %v1998_v59 = vpop.eup %1997  ;;  %v1330_v17 = vmul.f32 1.442695, %v2650_v37  ;;  %1380 = vadd.xlane.f32.xlu1 %v1996_v39 }
 0x372   : > { %v1332_v20 = vmul.f32 1.442695, %v2653_v38  ;;  %1390 = vadd.xlane.f32.xlu0 %v1998_v59  ;;  %v1243_v44 = vpop.xlane.xlu0 %1242  ;;  %v2000_v61 = vpop.eup %1999 }
 0x373   : > { %2009 = vpow2.f32 %v1330_v17  ;;  %v2658_v40 = vsub.f32 %v2530_v1, %v1243_v44 }
 0x374   : > { %v1245_v50 = vpop.xlane.xlu1 %1244  ;;  %2011 = vpow2.f32 %v1332_v20 }
 0x375   : > { %v2002_v43 = vpop.eup %2001  ;;  %v1338_v21 = vmul.f32 1.442695, %v2658_v40  ;;  %v2662_v62 = vsub.f32 %v2533_v4, %v1245_v50  ;;  %1392 = vadd.xlane.f32.xlu1 %v2000_v61 }
 0x376   : > { %1386 = vadd.xlane.f32.xlu0 %v2002_v43  ;;  %v1247_v55 = vpop.xlane.xlu0 %1246  ;;  %v2004_v1 = vpop.eup %2003 }
 0x377   : > { %2013 = vpow2.f32 %v1338_v21  ;;  %v1340_v57 = vmul.f32 1.442695, %v2662_v62  ;;  %v2666_v45 = vsub.f32 %v2537_v5, %v1247_v55 }
 0x378   : > { %v1249_v23 = vpop.xlane.xlu1 %1248 }
 0x379   : > { %v2006_v46 = vpop.eup %2005  ;;  %2015 = vpow2.f32 %v1340_v57  ;;  %v1342_v26 = vmul.f32 1.442695, %v2666_v45  ;;  %v2670_v2 = vsub.f32 %v2541_v7, %v1249_v23  ;;  %1388 = vadd.xlane.f32.xlu1 %v2004_v1 }
 0x37a   : > { %1398 = vadd.xlane.f32.xlu0 %v2006_v46  ;;  %v2008_v3 = vpop.eup %2007 }
 0x37b   : > { %2017 = vpow2.f32 %v1342_v26  ;;  %v1344_v4 = vmul.f32 1.442695, %v2670_v2 }
 0x37d   : > { %v2010_v48 = vpop.eup %2009  ;;  %2019 = vpow2.f32 %v1344_v4  ;;  %1400 = vadd.xlane.f32.xlu1 %v2008_v3 }
 0x37e   : > { %1394 = vadd.xlane.f32.xlu0 %v2010_v48  ;;  %v2012_v5 = vpop.eup %2011 }
 0x381   : > { %v2014_v13 = vpop.eup %2013  ;;  %1396 = vadd.xlane.f32.xlu1 %v2012_v5 }
 0x382   : > { %1402 = vadd.xlane.f32.xlu0 %v2014_v13 }
 0x383   : > { %v2016_v51 = vpop.eup %2015 }
 0x385   : > { %v2018_v19 = vpop.eup %2017  ;;  %1404 = vadd.xlane.f32.xlu1 %v2016_v51 }
 0x386   : > { %1406 = vadd.xlane.f32.xlu0 %v2018_v19 }
 0x387   : > { %v2020_v7 = vpop.eup %2019 }
 0x389   : > { %1408 = vadd.xlane.f32.xlu1 %v2020_v7 }
 0x3d6   : > { %v1351_v32 = vpop.xlane.xlu0 %1350 }
 0x3d7   : > { %2021 = vlog2.f32 %v1351_v32 }
 0x3da   : > { %v1353_v22 = vpop.xlane.xlu1 %1352  ;;  %v1347_v53 = vpop.xlane.xlu0 %1346 }
 0x3db   : > { %2023 = vlog2.f32 %v1353_v22 }
 0x3dc   : > { %2025 = vlog2.f32 %v1347_v53 }
 0x3de   : > { %v1349_v8 = vpop.xlane.xlu1 %1348 }
 0x3df   : > { %2027 = vlog2.f32 %v1349_v8  ;;  %v1359_v54 = vpop.xlane.xlu0 %1358 }
 0x3e0   : > { %2029 = vlog2.f32 %v1359_v54 }
 0x3e1   : > { %v2022_v30 = vpop.eup %2021 }
 0x3e2   : > { %v1415_v14 = vmul.f32 0.6931472, %v2022_v30  ;;  %v1361_v15 = vpop.xlane.xlu1 %1360 }
 0x3e3   : > { %2031 = vlog2.f32 %v1361_v15  ;;  %v1355_v56 = vpop.xlane.xlu0 %1354 }
 0x3e4   : > { %v1476_v39 = vsub.f32 %v2546_v12, %v1415_v14  ;;  %2033 = vlog2.f32 %v1355_v56 }
 0x3e5   : > { %v2024_v59 = vpop.eup %2023 }
 0x3e6   : > { %v2026_v17 = vpop.eup %2025  ;;  %1508 = vst [vmem:[%s2677_s20 + $0x10] sm:$0xff] %v1476_v39  ;;  %v1417_v20 = vmul.f32 0.6931472, %v2024_v59  ;;  %v1357_v44 = vpop.xlane.xlu1 %1356 }
 0x3e7   : > { %v1411_v61 = vmul.f32 0.6931472, %v2026_v17  ;;  %2035 = vlog2.f32 %v1357_v44  ;;  %v1367_v50 = vpop.xlane.xlu0 %1366 }
 0x3e8   : > { %v1477_v43 = vsub.f32 %v2554_v6, %v1417_v20  ;;  %2037 = vlog2.f32 %v1367_v50 }
 0x3e9   : > { %v2028_v21 = vpop.eup %2027  ;;  %v1474_v12 = vsub.f32 %v2549_v16, %v1411_v61 }
 0x3ea   : > { %v2030_v55 = vpop.eup %2029  ;;  %1509 = vst [vmem:[%s2677_s20 + $0x18] sm:$0xff] %v1477_v43  ;;  %v1413_v57 = vmul.f32 0.6931472, %v2028_v21  ;;  %v1369_v1 = vpop.xlane.xlu1 %1368 }
 0x3eb   : > { %1506 = vst [vmem:[%s2677_s20] sm:$0xff] %v1474_v12  ;;  %v1423_v23 = vmul.f32 0.6931472, %v2030_v55  ;;  %2039 = vlog2.f32 %v1369_v1  ;;  %v1363_v46 = vpop.xlane.xlu0 %1362 }
 0x3ec   : > { %v1475_v26 = vsub.f32 %v2557_v24, %v1413_v57  ;;  %2041 = vlog2.f32 %v1363_v46 }
 0x3ed   : > { %v2032_v4 = vpop.eup %2031  ;;  %v1480_v6 = vsub.f32 %v2562_v27, %v1423_v23 }
 0x3ee   : > { %v2034_v3 = vpop.eup %2033  ;;  %1507 = vst [vmem:[%s2677_s20 + $0x8] sm:$0xff] %v1475_v26  ;;  %v1425_v16 = vmul.f32 0.6931472, %v2032_v4  ;;  %v1365_v48 = vpop.xlane.xlu1 %1364 }
 0x3ef   : > { %1512 = vst [vmem:[%s2677_s20 + $0x30] sm:$0xff] %v1480_v6  ;;  %v1419_v5 = vmul.f32 0.6931472, %v2034_v3  ;;  %2043 = vlog2.f32 %v1365_v48  ;;  %v1375_v13 = vpop.xlane.xlu0 %1374 }
 0x3f0   : > { %v1481_v51 = vsub.f32 %v2565_v33, %v1425_v16  ;;  %2045 = vlog2.f32 %v1375_v13 }
 0x3f1   : > { %v2036_v19 = vpop.eup %2035  ;;  %v1478_v24 = vsub.f32 %v2570_v36, %v1419_v5 }
 0x3f2   : > { %v2038_v7 = vpop.eup %2037  ;;  %1513 = vst [vmem:[%s2677_s20 + $0x38] sm:$0xff] %v1481_v51  ;;  %v1421_v27 = vmul.f32 0.6931472, %v2036_v19  ;;  %v1377_v32 = vpop.xlane.xlu1 %1376 }
 0x3f3   : > { %1510 = vst [vmem:[%s2677_s20 + $0x20] sm:$0xff] %v1478_v24  ;;  %v1431_v22 = vmul.f32 0.6931472, %v2038_v7  ;;  %2047 = vlog2.f32 %v1377_v32  ;;  %v1371_v53 = vpop.xlane.xlu0 %1370 }
 0x3f4   : > { %v1479_v8 = vsub.f32 %v2573_v42, %v1421_v27  ;;  %2049 = vlog2.f32 %v1371_v53 }
 0x3f5   : > { %v2040_v54 = vpop.eup %2039  ;;  %v1484_v33 = vsub.f32 %v2578_v49, %v1431_v22 }
 0x3f6   : > { %v2042_v30 = vpop.eup %2041  ;;  %1511 = vst [vmem:[%s2677_s20 + $0x28] sm:$0xff] %v1479_v8  ;;  %v1433_v36 = vmul.f32 0.6931472, %v2040_v54  ;;  %v1373_v14 = vpop.xlane.xlu1 %1372 }
 0x3f7   : > { %1516 = vst [vmem:[%s2677_s20 + $0x50] sm:$0xff] %v1484_v33  ;;  %v1427_v15 = vmul.f32 0.6931472, %v2042_v30  ;;  %2051 = vlog2.f32 %v1373_v14  ;;  %v1383_v56 = vpop.xlane.xlu0 %1382 }
 0x3f8   : > { %v1485_v39 = vsub.f32 %v2581_v52, %v1433_v36  ;;  %2053 = vlog2.f32 %v1383_v56 }
 0x3f9   : > { %v2044_v59 = vpop.eup %2043  ;;  %v1482_v42 = vsub.f32 %v2586_v58, %v1427_v15 }
 0x3fa   : > { %v2046_v17 = vpop.eup %2045  ;;  %1517 = vst [vmem:[%s2677_s20 + $0x58] sm:$0xff] %v1485_v39  ;;  %v1429_v49 = vmul.f32 0.6931472, %v2044_v59  ;;  %v1385_v20 = vpop.xlane.xlu1 %1384 }
 0x3fb   : > { %1514 = vst [vmem:[%s2677_s20 + $0x40] sm:$0xff] %v1482_v42  ;;  %v1439_v44 = vmul.f32 0.6931472, %v2046_v17  ;;  %2055 = vlog2.f32 %v1385_v20  ;;  %v1379_v61 = vpop.xlane.xlu0 %1378 }
 0x3fc   : > { %v1483_v50 = vsub.f32 %v2589_v63, %v1429_v49  ;;  %2057 = vlog2.f32 %v1379_v61 }
 0x3fd   : > { %v2048_v43 = vpop.eup %2047  ;;  %v1488_v52 = vsub.f32 %v2594_v10, %v1439_v44 }
 0x3fe   : > { %v2050_v21 = vpop.eup %2049  ;;  %1515 = vst [vmem:[%s2677_s20 + $0x48] sm:$0xff] %v1483_v50  ;;  %v1441_v58 = vmul.f32 0.6931472, %v2048_v43  ;;  %v1381_v12 = vpop.xlane.xlu1 %1380 }
 0x3ff   : > { %1520 = vst [vmem:[%s2677_s20 + $0x70] sm:$0xff] %v1488_v52  ;;  %v1435_v55 = vmul.f32 0.6931472, %v2050_v21  ;;  %2059 = vlog2.f32 %v1381_v12  ;;  %v1391_v57 = vpop.xlane.xlu0 %1390 }
 0x400   : > { %v1489_v1 = vsub.f32 %v2597_v18, %v1441_v58  ;;  %2061 = vlog2.f32 %v1391_v57 }
 0x401   : > { %v2052_v23 = vpop.eup %2051  ;;  %v1486_v63 = vsub.f32 %v2602_v9, %v1435_v55 }
 0x402   : > { %v2054_v46 = vpop.eup %2053  ;;  %1521 = vst [vmem:[%s2677_s20 + $0x78] sm:$0xff] %v1489_v1  ;;  %v1437_v10 = vmul.f32 0.6931472, %v2052_v23  ;;  %v1393_v26 = vpop.xlane.xlu1 %1392 }
 0x403   : > { %1518 = vst [vmem:[%s2677_s20 + $0x60] sm:$0xff] %v1486_v63  ;;  %v1447_v4 = vmul.f32 0.6931472, %v2054_v46  ;;  %2063 = vlog2.f32 %v1393_v26  ;;  %v1387_v6 = vpop.xlane.xlu0 %1386 }
 0x404   : > { %v1487_v3 = vsub.f32 %v2605_v25, %v1437_v10  ;;  %2065 = vlog2.f32 %v1387_v6 }
 0x405   : > { %v2056_v16 = vpop.eup %2055  ;;  %v1492_v18 = vsub.f32 %v2610_v34, %v1447_v4 }
 0x406   : > { %v2058_v48 = vpop.eup %2057  ;;  %1519 = vst [vmem:[%s2677_s20 + $0x68] sm:$0xff] %v1487_v3  ;;  %v1449_v9 = vmul.f32 0.6931472, %v2056_v16  ;;  %v1389_v5 = vpop.xlane.xlu1 %1388 }
 0x407   : > { %1524 = vst [vmem:[%s2677_s20 + $0x90] sm:$0xff] %v1492_v18  ;;  %v1443_v13 = vmul.f32 0.6931472, %v2058_v48  ;;  %2067 = vlog2.f32 %v1389_v5  ;;  %v1399_v51 = vpop.xlane.xlu0 %1398 }
 0x408   : > { %v1493_v19 = vsub.f32 %v2613_v41, %v1449_v9  ;;  %2069 = vlog2.f32 %v1399_v51 }
 0x409   : > { %v2060_v24 = vpop.eup %2059  ;;  %v1490_v25 = vsub.f32 %v2618_v47, %v1443_v13 }
 0x40a   : > { %v2062_v7 = vpop.eup %2061  ;;  %1525 = vst [vmem:[%s2677_s20 + $0x98] sm:$0xff] %v1493_v19  ;;  %v1445_v34 = vmul.f32 0.6931472, %v2060_v24  ;;  %v1401_v27 = vpop.xlane.xlu1 %1400 }
 0x40b   : > { %1522 = vst [vmem:[%s2677_s20 + $0x80] sm:$0xff] %v1490_v25  ;;  %v1455_v32 = vmul.f32 0.6931472, %v2062_v7  ;;  %2071 = vlog2.f32 %v1401_v27  ;;  %v1395_v22 = vpop.xlane.xlu0 %1394 }
 0x40c   : > { %v1491_v53 = vsub.f32 %v2621_v11, %v1445_v34  ;;  %2073 = vlog2.f32 %v1395_v22 }
 0x40d   : > { %v2064_v8 = vpop.eup %2063  ;;  %v1496_v41 = vsub.f32 %v2626_v60, %v1455_v32 }
 0x40e   : > { %v2066_v54 = vpop.eup %2065  ;;  %1523 = vst [vmem:[%s2677_s20 + $0x88] sm:$0xff] %v1491_v53  ;;  %v1457_v47 = vmul.f32 0.6931472, %v2064_v8  ;;  %v1397_v33 = vpop.xlane.xlu1 %1396 }
 0x40f   : > { %1528 = vst [vmem:[%s2677_s20 + $0xb0] sm:$0xff] %v1496_v41  ;;  %v1451_v30 = vmul.f32 0.6931472, %v2066_v54  ;;  %2075 = vlog2.f32 %v1397_v33  ;;  %v1403_v36 = vpop.xlane.xlu0 %1402 }
 0x410   : > { %v1497_v14 = vsub.f32 %v2629_v0, %v1457_v47  ;;  %2077 = vlog2.f32 %v1403_v36 }
 0x411   : > { %v2068_v15 = vpop.eup %2067  ;;  %v1494_v11 = vsub.f32 %v2634_v28, %v1451_v30 }
 0x412   : > { %v2070_v56 = vpop.eup %2069  ;;  %1529 = vst [vmem:[%s2677_s20 + $0xb8] sm:$0xff] %v1497_v14  ;;  %v1453_v60 = vmul.f32 0.6931472, %v2068_v15  ;;  %v1405_v39 = vpop.xlane.xlu1 %1404 }
 0x413   : > { %1526 = vst [vmem:[%s2677_s20 + $0xa0] sm:$0xff] %v1494_v11  ;;  %v1463_v59 = vmul.f32 0.6931472, %v2070_v56  ;;  %2079 = vlog2.f32 %v1405_v39  ;;  %v1407_v42 = vpop.xlane.xlu0 %1406 }
 0x414   : > { %v1495_v17 = vsub.f32 %v2637_v29, %v1453_v60  ;;  %2081 = vlog2.f32 %v1407_v42 }
 0x415   : > { %v2072_v0 = vpop.eup %2071  ;;  %v1500_v49 = vsub.f32 %v2642_v31, %v1463_v59 }
 0x416   : > { %v2074_v20 = vpop.eup %2073  ;;  %1527 = vst [vmem:[%s2677_s20 + $0xa8] sm:$0xff] %v1495_v17  ;;  %v1465_v28 = vmul.f32 0.6931472, %v2072_v0  ;;  %v1409_v44 = vpop.xlane.xlu1 %1408 }
 0x417   : > { %1532 = vst [vmem:[%s2677_s20 + $0xd0] sm:$0xff] %v1500_v49  ;;  %v1459_v61 = vmul.f32 0.6931472, %v2074_v20  ;;  %2083 = vlog2.f32 %v1409_v44 }
 0x418   : > { %v1501_v50 = vsub.f32 %v2645_v35, %v1465_v28 }
 0x419   : > { %v2076_v43 = vpop.eup %2075  ;;  %v1498_v29 = vsub.f32 %v2650_v37, %v1459_v61 }
 0x41a   : > { %v2078_v52 = vpop.eup %2077  ;;  %1533 = vst [vmem:[%s2677_s20 + $0xd8] sm:$0xff] %v1501_v50  ;;  %v1461_v21 = vmul.f32 0.6931472, %v2076_v43 }
 0x41b   : > { %1530 = vst [vmem:[%s2677_s20 + $0xc0] sm:$0xff] %v1498_v29  ;;  %v1467_v31 = vmul.f32 0.6931472, %v2078_v52 }
 0x41c   : > { %v1499_v58 = vsub.f32 %v2653_v38, %v1461_v21 }
 0x41d   : > { %v2080_v12 = vpop.eup %2079  ;;  %v1502_v55 = vsub.f32 %v2658_v40, %v1467_v31 }
 0x41e   : > { %v2082_v57 = vpop.eup %2081  ;;  %1531 = vst [vmem:[%s2677_s20 + $0xc8] sm:$0xff] %v1499_v58  ;;  %v1469_v35 = vmul.f32 0.6931472, %v2080_v12 }
 0x41f   : > { %1534 = vst [vmem:[%s2677_s20 + $0xe0] sm:$0xff] %v1502_v55  ;;  %v1471_v37 = vmul.f32 0.6931472, %v2082_v57 }
 0x420   : > { %v1503_v1 = vsub.f32 %v2662_v62, %v1469_v35 }
 0x421   : > { %v2084_v23 = vpop.eup %2083  ;;  %v1504_v63 = vsub.f32 %v2666_v45, %v1471_v37 }
 0x422   : > { %1535 = vst [vmem:[%s2677_s20 + $0xe8] sm:$0xff] %v1503_v1  ;;  %v1473_v38 = vmul.f32 0.6931472, %v2084_v23 }
 0x423   : > { %1536 = vst [vmem:[%s2677_s20 + $0xf0] sm:$0xff] %v1504_v63 }
 0x424   : > { %v1505_v40 = vsub.f32 %v2670_v2, %v1473_v38 }
 0x426   : > { %1537 = vst [vmem:[%s2677_s20 + $0xf8] sm:$0xff] %v1505_v40 }
 0x427   : > { %2098 = shalt.err (!%p2095_p3)
}
 0x428   : > { %s2099_s16 = scalar_lea.hbm %s2745_s9, 4096  ;;  %s2103_s19 = scalar_lea.hbm %s2801_s7, 8192 }
 0x429   : > { %p2100_p4 = scmp.ne.s32.totalorder %s2745_s9, %s2099_s16  ;;  %p2104_p9 = scmp.lt.u32.totalorder %s2745_s9, %s2801_s7 }
 0x42a   : > { %p2105_p10 = scmp.lt.u32.totalorder %s2103_s19, %s2099_s16  ;;  %p2107_p12 = scmp.lt.u32.totalorder %s2099_s16, %s2745_s9 }
 0x42b   : > { %p2101_p7 = pnand %p2100_p4, %p2230_p5 }
 0x42c   : > { %p2106_p11 = por %p2105_p10, %p2104_p9 }
 0x42d   : > { %p2102_p8 = pneg %p2101_p7 }
 0x42e   : > { %p2108_p13 = por %p2107_p12, %p2106_p11 }
 0x430   : > { %p2109_p0 = pnand %p2108_p13, %p2102_p8 }
 0x432   : > { %2112 = shalt.err (!%p2109_p0)
}
 0x433   : > { %s2150_s29 = smov 128   ;;  %s2151_s8 = smov 8  }
 0x434   : > { %1882 = dma.vmem_to_hbm [thread:$0]  (%p2230_p5), %s2747_s22, 4096, %s2745_s9, %s2753_s28, %s2150_s29, %s2150_s29, %s2151_s8  }
 0x435 PF: > { %p1888_p1 = scmp.ge.s32.totalorder %s2147_s27, 2  ;;  %s1567_s23 = sand.u32 1, %s2135_s24  }
 0x436   : > { %s1568_s13 = scalar_lea.sflag [#allocation3], %s1567_s23 }
 0x437   : > { %p1885_p2 = pnand %p1888_p1, %p2234_p6 }
 0x439   : > { %2130 = dma.done.wait (!%p1885_p2), %s1568_s13, 4096  }
 0x43a   : > { %2132 = vsyncadd (!%p1885_p2), %s1568_s13, 4294963200  ;;  %p17_p3 = scmp.ge.s32.totalorder %s2217_s30, 4   ;;  %s2804_s24 = smov %s2139_s25 }
 0x43b   : > { %s2805_s25 = smov %s2143_s26  ;;  %s2806_s26 = smov %s2228_s10 }
 0x43c   : > { %s2807_s27 = smov %s2217_s30  ;;  %19 = sbr.rel (!%p17_p3) target bundleno = 3 (0x3), region = 83 }
 0x443   :  { %1573 = vsyncpa [#allocation3], 1 }
 0x444   :  { %1575 = vsyncpa [#allocation3 + $0x1], 1 }

</bundles_post_ra>
